<compile_context>
chip_gen: v6e
topology: v6e:2x2x1
jax: 0.10.0
libtpu: 0.0.40
codegen_flags: <defaults>
</compile_context>

<pallas_src>
import jax
import jax.numpy as jnp
from jax.experimental import pallas as pl
from jax.experimental.pallas import tpu as pltpu


def _round_up(x, m):
    return ((x + m - 1) // m) * m


def _tensorcores_per_chip():
    """Best-effort detection of TensorCores a 'parallel' grid axis can use."""
    try:
        kind = jax.devices()[0].device_kind.lower()
    except Exception:
        return 1
    # v4 / v5p (megacore) and v7x expose 2 TensorCores per chip; v2/v3/v5e/v6e
    # are effectively single-TC for grid sharding purposes.
    return 2 if any(tag in kind for tag in ("v4", "v5p", "v7")) else 1


def _critic_kernel(x_ref,
                   w1_ref, b1_ref,
                   w2_ref, b2_ref,
                   w3_ref, b3_ref,
                   w4_ref, b4_ref,
                   o_ref):
    # All activations are (H, TB): batch on the lane axis, fully dense vregs.
    x = x_ref[...]                                           # (in_dim, TB)
    h = jnp.dot(w1_ref[...], x, preferred_element_type=jnp.float32)
    h = jnp.maximum(h + b1_ref[...], 0.0)                    # (H1, TB)
    h = jnp.dot(w2_ref[...], h, preferred_element_type=jnp.float32)
    h = jnp.maximum(h + b2_ref[...], 0.0)                    # (H2, TB)
    h = jnp.dot(w3_ref[...], h, preferred_element_type=jnp.float32)
    h = jnp.maximum(h + b3_ref[...], 0.0)                    # (H3, TB)
    q = jnp.dot(w4_ref[...], h, preferred_element_type=jnp.float32)
    o_ref[...] = (q + b4_ref[...]).astype(o_ref.dtype)       # (out_dim, TB)


def critic_td3_forward(state, action, params, *, max_block_b=32768):
    """Pallas forward pass of CriticTD3.

    state:  (B, S)   action: (B, A)   with S + A == input_size
    params: dict with w1..w4 of shape (out, in) and b1..b4 of shape (out, 1)
            (PyTorch nn.Linear layout).
    returns (B, out_dim) float32 Q-values.
    """
    B = state.shape[0]
    in_dim = state.shape[1] + action.shape[1]
    out_dim = params["w4"].shape[0]

    w1, b1 = params["w1"], params["b1"]
    w2, b2 = params["w2"], params["b2"]
    w3, b3 = params["w3"], params["b3"]
    w4, b4 = params["w4"], params["b4"]

    # Merged layer-1 input (single K=in_dim matmul inside the kernel).
    x = jnp.concatenate([state, action], axis=1).astype(jnp.float32)  # (B, in)

    # Tile policy: one grid step per TensorCore, VMEM-safe cap, lane multiple.
    cores = _tensorcores_per_chip()
    TB = _round_up(pl.cdiv(max(B, 1), cores), 128)
    TB = min(TB, _round_up(max_block_b, 128))
    B_pad = _round_up(B, TB)
    if B_pad != B:
        x = jnp.pad(x, ((0, B_pad - B), (0, 0)))

    # Batch-on-lanes input: a streamed tile is (in_dim, TB), ~TB*in_dim*4 bytes
    # (no lane padding blow-up).
    x_t = x.T                                                 # (in_dim, B_pad)

    grid = (B_pad // TB,)

    in_specs = [
        pl.BlockSpec((in_dim, TB), lambda i: (0, i)),         # input (streamed)
        pl.BlockSpec(w1.shape, lambda i: (0, 0)),             # weights/biases:
        pl.BlockSpec(b1.shape, lambda i: (0, 0)),             # constant index
        pl.BlockSpec(w2.shape, lambda i: (0, 0)),             # maps -> stay
        pl.BlockSpec(b2.shape, lambda i: (0, 0)),             # resident in VMEM
        pl.BlockSpec(w3.shape, lambda i: (0, 0)),
        pl.BlockSpec(b3.shape, lambda i: (0, 0)),
        pl.BlockSpec(w4.shape, lambda i: (0, 0)),
        pl.BlockSpec(b4.shape, lambda i: (0, 0)),
    ]
    out_spec = pl.BlockSpec((out_dim, TB), lambda i: (0, i))  # lane-dense out

    q_t = pl.pallas_call(
        _critic_kernel,
        grid=grid,
        in_specs=in_specs,
        out_specs=out_spec,
        out_shape=jax.ShapeDtypeStruct((out_dim, B_pad), jnp.float32),
        compiler_params=pltpu.CompilerParams(
            dimension_semantics=("parallel",)),
    )(x_t, w1, b1, w2, b2, w3, b3, w4, b4)

    # Lean epilogue: (1, B_pad) -> (B, 1) is a layout-free reshape; only slice
    # when padding was actually added.
    if out_dim == 1:
        q = q_t.reshape(B_pad, 1)
        return q if B_pad == B else q[:B]
    q = q_t if B_pad == B else q_t[:, :B]
    return q.T


def init_params(key, input_size, hidden_size, num_actions):
    """PyTorch nn.Linear default init: U(-1/sqrt(fan_in), 1/sqrt(fan_in)).

    Weights stored in PyTorch layout (out, in); biases as (out, 1).
    """
    dims_in = [input_size, hidden_size[0], hidden_size[1], hidden_size[2]]
    dims_out = [hidden_size[0], hidden_size[1], hidden_size[2], num_actions]
    params = {}
    for i, (d_in, d_out) in enumerate(zip(dims_in, dims_out), start=1):
        key, kw, kb = jax.random.split(key, 3)
        bound = 1.0 / jnp.sqrt(jnp.float32(d_in))
        params[f"w{i}"] = jax.random.uniform(
            kw, (d_out, d_in), jnp.float32, minval=-bound, maxval=bound)
        params[f"b{i}"] = jax.random.uniform(
            kb, (d_out, 1), jnp.float32, minval=-bound, maxval=bound)
    return params


def _reference_forward(state, action, params):
    """Pure-JAX reference mirroring the PyTorch forward exactly."""
    x = jnp.concatenate([state, action], axis=1)
    x = jnp.maximum(x @ params["w1"].T + params["b1"].T, 0.0)
    x = jnp.maximum(x @ params["w2"].T + params["b2"].T, 0.0)
    x = jnp.maximum(x @ params["w3"].T + params["b3"].T, 0.0)
    return x @ params["w4"].T + params["b4"].T


if __name__ == "__main__":
    # Pendulum-ish small shapes: obs dim 3, action dim 1 -> input_size = 4.
    obs_dim = 3
    act_dim = 1
    input_size = obs_dim + act_dim
    hidden_size = [32, 32, 32]
    num_actions = 1  # Q-value output dim (matches the module's num_actions)

    key = jax.random.PRNGKey(0)
    k_state, k_action, k_params = jax.random.split(key, 3)
    params = init_params(k_params, input_size, hidden_size, num_actions)

    # Primary small check (single tile, padded batch path).
    batch = 8
    state = jax.random.normal(k_state, (batch, obs_dim), jnp.float32)
    action = jax.random.normal(k_action, (batch, act_dim), jnp.float32)

    q = jax.block_until_ready(critic_td3_forward(state, action, params))
    q_ref = _reference_forward(state, action, params)
    assert q.shape == (batch, num_actions)
    assert jnp.allclose(q, q_ref, atol=1e-5, rtol=1e-5), "mismatch (B=8)"

    # Secondary check: exact-multiple batch, default tile policy.
    batch2 = 256
    k_s2, k_a2 = jax.random.split(jax.random.PRNGKey(1))
    state2 = jax.random.normal(k_s2, (batch2, obs_dim), jnp.float32)
    action2 = jax.random.normal(k_a2, (batch2, act_dim), jnp.float32)
    q2 = jax.block_until_ready(critic_td3_forward(state2, action2, params))
    q2_ref = _reference_forward(state2, action2, params)
    assert q2.shape == (batch2, num_actions)
    assert jnp.allclose(q2, q2_ref, atol=1e-5, rtol=1e-5), "mismatch (B=256)"

    # Third check: force a multi-step grid to exercise resident-weight reuse.
    q3 = jax.block_until_ready(
        critic_td3_forward(state2, action2, params, max_block_b=128))
    assert jnp.allclose(q3, q2_ref, atol=1e-5, rtol=1e-5), "mismatch (grid>1)"

    print("KERNEL_OK")
</pallas_src>

<mosaic_0001>
module attributes {stable_mosaic.version = 11 : i64} {
  func.func @_critic_kernel(%arg0: i32, %arg1: memref<4x128xf32, #tpu.memory_space<vmem>>, %arg2: memref<32x4xf32, #tpu.memory_space<vmem>>, %arg3: memref<32x1xf32, #tpu.memory_space<vmem>>, %arg4: memref<32x32xf32, #tpu.memory_space<vmem>>, %arg5: memref<32x1xf32, #tpu.memory_space<vmem>>, %arg6: memref<32x32xf32, #tpu.memory_space<vmem>>, %arg7: memref<32x1xf32, #tpu.memory_space<vmem>>, %arg8: memref<1x32xf32, #tpu.memory_space<vmem>>, %arg9: memref<1x1xf32, #tpu.memory_space<vmem>>, %arg10: memref<1x128xf32, #tpu.memory_space<vmem>>) attributes {dimension_semantics = [#tpu.dimension_semantics<parallel>], iteration_bounds = array<i64: 1>, scalar_prefetch = 0 : i64, scratch_operands = 0 : i64, tpu.core_type = #tpu.core_type<tc>, window_params = [{transform_indices = @transform_0, window_bounds = array<i64: 4, 128>}, {pipeline_mode = #tpu.pipeline_mode<synchronous>, transform_indices = @transform_1, window_bounds = array<i64: 32, 4>}, {pipeline_mode = #tpu.pipeline_mode<synchronous>, transform_indices = @transform_2, window_bounds = array<i64: 32, 1>}, {pipeline_mode = #tpu.pipeline_mode<synchronous>, transform_indices = @transform_3, window_bounds = array<i64: 32, 32>}, {pipeline_mode = #tpu.pipeline_mode<synchronous>, transform_indices = @transform_4, window_bounds = array<i64: 32, 1>}, {pipeline_mode = #tpu.pipeline_mode<synchronous>, transform_indices = @transform_5, window_bounds = array<i64: 32, 32>}, {pipeline_mode = #tpu.pipeline_mode<synchronous>, transform_indices = @transform_6, window_bounds = array<i64: 32, 1>}, {pipeline_mode = #tpu.pipeline_mode<synchronous>, transform_indices = @transform_7, window_bounds = array<i64: 1, 32>}, {pipeline_mode = #tpu.pipeline_mode<synchronous>, transform_indices = @transform_8, window_bounds = array<i64: 1, 1>}, {transform_indices = @transform_9, window_bounds = array<i64: 1, 128>}]} {
    %c0 = arith.constant 0 : index
    %c0_0 = arith.constant 0 : index
    %0 = vector.load %arg1[%c0, %c0_0] : memref<4x128xf32, #tpu.memory_space<vmem>>, vector<4x128xf32>
    %c0_1 = arith.constant 0 : index
    %c0_2 = arith.constant 0 : index
    %1 = vector.load %arg2[%c0_1, %c0_2] : memref<32x4xf32, #tpu.memory_space<vmem>>, vector<32x4xf32>
    %cst = arith.constant dense<0.000000e+00> : vector<32x128xf32>
    %2 = tpu.matmul %1, %0, %cst {dimension_numbers = #tpu.dot_dimension_numbers<[1], [0], [0], [1], [0, 0, 1, 1], [], []>} : vector<32x4xf32>, vector<4x128xf32>, vector<32x128xf32> -> vector<32x128xf32>
    %c0_3 = arith.constant 0 : index
    %c0_4 = arith.constant 0 : index
    %3 = vector.load %arg3[%c0_3, %c0_4] : memref<32x1xf32, #tpu.memory_space<vmem>>, vector<32x1xf32>
    %4 = vector.broadcast %3 : vector<32x1xf32> to vector<32x128xf32>
    %5 = arith.addf %2, %4 : vector<32x128xf32>
    %cst_5 = arith.constant 0.000000e+00 : f32
    %6 = vector.broadcast %cst_5 : f32 to vector<32x128xf32>
    %7 = arith.maximumf %5, %6 : vector<32x128xf32>
    %c0_6 = arith.constant 0 : index
    %c0_7 = arith.constant 0 : index
    %8 = vector.load %arg4[%c0_6, %c0_7] : memref<32x32xf32, #tpu.memory_space<vmem>>, vector<32x32xf32>
    %cst_8 = arith.constant dense<0.000000e+00> : vector<32x128xf32>
    %9 = tpu.matmul %8, %7, %cst_8 {dimension_numbers = #tpu.dot_dimension_numbers<[1], [0], [0], [1], [0, 0, 1, 1], [], []>} : vector<32x32xf32>, vector<32x128xf32>, vector<32x128xf32> -> vector<32x128xf32>
    %c0_9 = arith.constant 0 : index
    %c0_10 = arith.constant 0 : index
    %10 = vector.load %arg5[%c0_9, %c0_10] : memref<32x1xf32, #tpu.memory_space<vmem>>, vector<32x1xf32>
    %11 = vector.broadcast %10 : vector<32x1xf32> to vector<32x128xf32>
    %12 = arith.addf %9, %11 : vector<32x128xf32>
    %cst_11 = arith.constant 0.000000e+00 : f32
    %13 = vector.broadcast %cst_11 : f32 to vector<32x128xf32>
    %14 = arith.maximumf %12, %13 : vector<32x128xf32>
    %c0_12 = arith.constant 0 : index
    %c0_13 = arith.constant 0 : index
    %15 = vector.load %arg6[%c0_12, %c0_13] : memref<32x32xf32, #tpu.memory_space<vmem>>, vector<32x32xf32>
    %cst_14 = arith.constant dense<0.000000e+00> : vector<32x128xf32>
    %16 = tpu.matmul %15, %14, %cst_14 {dimension_numbers = #tpu.dot_dimension_numbers<[1], [0], [0], [1], [0, 0, 1, 1], [], []>} : vector<32x32xf32>, vector<32x128xf32>, vector<32x128xf32> -> vector<32x128xf32>
    %c0_15 = arith.constant 0 : index
    %c0_16 = arith.constant 0 : index
    %17 = vector.load %arg7[%c0_15, %c0_16] : memref<32x1xf32, #tpu.memory_space<vmem>>, vector<32x1xf32>
    %18 = vector.broadcast %17 : vector<32x1xf32> to vector<32x128xf32>
    %19 = arith.addf %16, %18 : vector<32x128xf32>
    %cst_17 = arith.constant 0.000000e+00 : f32
    %20 = vector.broadcast %cst_17 : f32 to vector<32x128xf32>
    %21 = arith.maximumf %19, %20 : vector<32x128xf32>
    %c0_18 = arith.constant 0 : index
    %c0_19 = arith.constant 0 : index
    %22 = vector.load %arg8[%c0_18, %c0_19] : memref<1x32xf32, #tpu.memory_space<vmem>>, vector<1x32xf32>
    %cst_20 = arith.constant dense<0.000000e+00> : vector<1x128xf32>
    %23 = tpu.matmul %22, %21, %cst_20 {dimension_numbers = #tpu.dot_dimension_numbers<[1], [0], [0], [1], [0, 0, 1, 1], [], []>} : vector<1x32xf32>, vector<32x128xf32>, vector<1x128xf32> -> vector<1x128xf32>
    %c0_21 = arith.constant 0 : index
    %c0_22 = arith.constant 0 : index
    %24 = vector.load %arg9[%c0_21, %c0_22] : memref<1x1xf32, #tpu.memory_space<vmem>>, vector<1x1xf32>
    %25 = vector.broadcast %24 : vector<1x1xf32> to vector<1x128xf32>
    %26 = arith.addf %23, %25 : vector<1x128xf32>
    %c0_23 = arith.constant 0 : index
    %c0_24 = arith.constant 0 : index
    %27 = vector.load %arg10[%c0_23, %c0_24] : memref<1x128xf32, #tpu.memory_space<vmem>>, vector<1x128xf32>
    tpu.vector_store %arg10[%c0_23, %c0_24], %26 {strides = array<i32>} : memref<1x128xf32, #tpu.memory_space<vmem>>, vector<1x128xf32>,
    return
  }
  func.func @transform_0(%arg0: i32) -> (i32, i32) {
    %c0_i32 = arith.constant 0 : i32
    %c0_i32_0 = arith.constant 0 : i32
    return %c0_i32, %arg0 : i32, i32
  }
  func.func @transform_1(%arg0: i32) -> (i32, i32) {
    %c0_i32 = arith.constant 0 : i32
    %c0_i32_0 = arith.constant 0 : i32
    %c0_i32_1 = arith.constant 0 : i32
    return %c0_i32, %c0_i32_0 : i32, i32
  }
  func.func @transform_2(%arg0: i32) -> (i32, i32) {
    %c0_i32 = arith.constant 0 : i32
    %c0_i32_0 = arith.constant 0 : i32
    %c0_i32_1 = arith.constant 0 : i32
    return %c0_i32, %c0_i32_0 : i32, i32
  }
  func.func @transform_3(%arg0: i32) -> (i32, i32) {
    %c0_i32 = arith.constant 0 : i32
    %c0_i32_0 = arith.constant 0 : i32
    %c0_i32_1 = arith.constant 0 : i32
    return %c0_i32, %c0_i32_0 : i32, i32
  }
  func.func @transform_4(%arg0: i32) -> (i32, i32) {
    %c0_i32 = arith.constant 0 : i32
    %c0_i32_0 = arith.constant 0 : i32
    %c0_i32_1 = arith.constant 0 : i32
    return %c0_i32, %c0_i32_0 : i32, i32
  }
  func.func @transform_5(%arg0: i32) -> (i32, i32) {
    %c0_i32 = arith.constant 0 : i32
    %c0_i32_0 = arith.constant 0 : i32
    %c0_i32_1 = arith.constant 0 : i32
    return %c0_i32, %c0_i32_0 : i32, i32
  }
  func.func @transform_6(%arg0: i32) -> (i32, i32) {
    %c0_i32 = arith.constant 0 : i32
    %c0_i32_0 = arith.constant 0 : i32
    %c0_i32_1 = arith.constant 0 : i32
    return %c0_i32, %c0_i32_0 : i32, i32
  }
  func.func @transform_7(%arg0: i32) -> (i32, i32) {
    %c0_i32 = arith.constant 0 : i32
    %c0_i32_0 = arith.constant 0 : i32
    %c0_i32_1 = arith.constant 0 : i32
    return %c0_i32, %c0_i32_0 : i32, i32
  }
  func.func @transform_8(%arg0: i32) -> (i32, i32) {
    %c0_i32 = arith.constant 0 : i32
    %c0_i32_0 = arith.constant 0 : i32
    %c0_i32_1 = arith.constant 0 : i32
    return %c0_i32, %c0_i32_0 : i32, i32
  }
  func.func @transform_9(%arg0: i32) -> (i32, i32) {
    %c0_i32 = arith.constant 0 : i32
    %c0_i32_0 = arith.constant 0 : i32
    return %c0_i32, %arg0 : i32, i32
  }
}

</mosaic_0001>

<bundles_post_ra>
// kernel: tpu_custom_call.1
= control target key start
LH: loop header
LB: loop body
LE: loop exit
PB: predicated region body
PF: predicated region fallthrough
CT: control target
= control target key end

     0   :  { %s794_s0 = inlined_call_operand.vmem [shape: f32[4,128], index: 0, kind: input, shape index: {}]   ;;  %s795_s1 = inlined_call_operand.vmem [shape: f32[32,4], index: 1, kind: input, shape index: {}]   ;;  %s796_s2 = inlined_call_operand.vmem [shape: f32[32,1], index: 2, kind: input, shape index: {}]   ;;  %s797_s3 = inlined_call_operand.vmem [shape: f32[32,32], index: 3, kind: input, shape index: {}]   ;;  %s798_s4 = inlined_call_operand.vmem [shape: f32[32,1], index: 4, kind: input, shape index: {}]   ;;  %s799_s5 = inlined_call_operand.vmem [shape: f32[32,32], index: 5, kind: input, shape index: {}]   ;;  %s800_s6 = inlined_call_operand.vmem [shape: f32[32,1], index: 6, kind: input, shape index: {}]   ;;  %s801_s7 = inlined_call_operand.vmem [shape: f32[1,32], index: 7, kind: input, shape index: {}]   ;;  %s802_s8 = inlined_call_operand.<no memory space> [shape: f32[1,1], index: 8, kind: input, shape index: {}]   ;;  %s803_s9 = inlined_call_operand.hbm [shape: f32[1,128], index: 9, kind: output, shape index: {}]  }
   0x1   :  { %v14_v0 = vstv %s802_s8 }
   0x2   :  { %15 = vst [vmem:[#allocation2] sm:$0x1] %v14_v0 }
   0x3   :  { %v35_v1 = vld [vmem:[%s794_s0] sm:$0xf]  ;;  %vm77_vm0 = vcmask 1043456   ;;  %vm64_vm1 = vcmask 31744   ;;  %v37_v3 = vld [vmem:[%s795_s1 + $0x8] sm:$0xff]  ;;  %v38_v4 = vld [vmem:[%s795_s1 + $0x10] sm:$0xff] }
   0x4   :  { %v36_v2 = vld [vmem:[%s795_s1] sm:$0xff]  ;;  %568 = vmatprep.subr.msk.mxu0 %vm77_vm0, %v35_v1  ;;  %v43_v5 = vld [vmem:[%s796_s2 + $0x18] sm:$0xff]  ;;  %v643_v6 = vmov 0   ;;  %v41_v7 = vld [vmem:[%s796_s2 + $0x8] sm:$0xff] }
   0x5   :  { %570 = vmatprep.mubr.msk.f32.mxu0 %vm64_vm1, %v36_v2  ;;  %569 = vmatpush3.msk.msra.mxu0 %vm77_vm0, %v35_v1  ;;  %v39_v8 = vld [vmem:[%s795_s1 + $0x18] sm:$0xff]  ;;  %v42_v9 = vld [vmem:[%s796_s2 + $0x10] sm:$0xff]  ;;  %v40_v10 = vld [vmem:[%s796_s2] sm:$0xff] }
   0x6   :  { %619 = vset.pattern.permute.xlu0 %v643_v6  ;;  %571 = vmatmul.mubr.msk.f32.vlgmr.msra.gmra.mxu0 %vm64_vm1, %v37_v3 }
   0x7   :  { %61 = vperm.xlu0 %619, %v43_v5   ;;  %573 = vmatprep.mubr.msk.f32.mxu0 %vm64_vm1, %v38_v4 }
   0x8   :  { %620 = vset.pattern.permute.xlu1 %v643_v6 }
   0x9   :  { %51 = vperm.xlu1 %620, %v41_v7  }
   0xa   :  { %16 = vsyncpa [#allocation4], 0  ;;  %574 = vmatmul.mubr.msk.f32.gmra.mxu0 %vm64_vm1, %v39_v8  ;;  %v177_v11 = vld [vmem:[%s798_s4 + $0x18] sm:$0xff]  ;;  %v176_v12 = vld [vmem:[%s798_s4 + $0x10] sm:$0xff]  ;;  %vm198_vm2 = vcmask 261120   ;;  %v644_v60 = vmov 0.0  }
   0xb   :  { %56 = vperm.xlu0 %619, %v42_v9   ;;  %v175_v13 = vld [vmem:[%s798_s4 + $0x8] sm:$0xff]  ;;  %v174_v14 = vld [vmem:[%s798_s4] sm:$0xff]  ;;  %v307_v15 = vld [vmem:[%s800_s6 + $0x18] sm:$0xff]  ;;  %vm645_vm3 = vmmov 0   ;;  %s646_s10 = smov [#allocation3]  }
   0xc   :  { %v306_v16 = vld [vmem:[%s800_s6 + $0x10] sm:$0xff]  ;;  %v305_v17 = vld [vmem:[%s800_s6 + $0x8] sm:$0xff]  ;;  %v304_v18 = vld [vmem:[%s800_s6] sm:$0xff]  ;;  %s520_s2 = sshll.u32 %s646_s10, 4  ;;  %s521_s2 = int_to_ptr.vmem [resolvable:$true] %s520_s2 }
   0xd   :  { %46 = vperm.xlu1 %620, %v40_v10   ;;  %v430_v19 = vld [vmem:[#allocation2] sm:$0x1]  ;;  %v171_v37 = vld [vmem:[%s797_s3 + $0x8] sm:$0xff]  ;;  %v172_v38 = vld [vmem:[%s797_s3 + $0x10] sm:$0xff]  ;;  %s621_s11 = scalar_lea.vmem %s521_s2, 16  ;;  %s625_s12 = scalar_lea.vmem %s521_s2, 32 }
   0xe   :  { %v170_v20 = vld [vmem:[%s797_s3] sm:$0xff]  ;;  %v173_v39 = vld [vmem:[%s797_s3 + $0x18] sm:$0xff]  ;;  %v301_v57 = vld [vmem:[%s799_s5 + $0x8] sm:$0xff]  ;;  %p622_p0 = scmp.ne.s32.totalorder %s521_s2, %s621_s11  ;;  %p626_p1 = scmp.lt.s32.totalorder %s521_s2, %s521_s2 }
   0xf   :  { %195 = vperm.xlu0 %619, %v177_v11   ;;  %584 = vmatprep.mubr.msk.f32.mxu1 %vm198_vm2, %v170_v20  ;;  %v300_v40 = vld [vmem:[%s799_s5] sm:$0xff]  ;;  %v302_v58 = vld [vmem:[%s799_s5 + $0x10] sm:$0xff]  ;;  %v303_v59 = vld [vmem:[%s799_s5 + $0x18] sm:$0xff]  ;;  %p627_p2 = scmp.lt.s32.totalorder %s625_s12, %s621_s11 }
  0x10   :  { %598 = vmatprep.mubr.msk.f32.mxu0 %vm198_vm2, %v300_v40 }
  0x11   :  { %190 = vperm.xlu1 %620, %v176_v12   ;;  %p628_p3 = por %p627_p2, %p626_p1 }
  0x13   :  { %185 = vperm.xlu0 %619, %v175_v13   ;;  %v429_v13 = vld [vmem:[%s801_s7] sm:$0x1]  ;;  %p629_p4 = pnand %p628_p3, %p622_p0 }
  0x15   :  { %180 = vperm.xlu1 %620, %v174_v14   ;;  %v436_v14 = vlaneseq }
  0x17   :  { %325 = vperm.xlu0 %619, %v307_v15   ;;  %v437_v15 = vshrl.u32 %v436_v14, 7 }
  0x19   :  { %320 = vperm.xlu1 %620, %v306_v16   ;;  %v438_v16 = vsub.s32 0, %v437_v15 }
  0x1b   :  { %315 = vperm.xlu0 %619, %v305_v17  }
  0x1d   :  { %310 = vperm.xlu1 %620, %v304_v18  }
  0x1f   :  { %433 = vperm.xlu0 %619, %v430_v19  }
  0x82   :  { %v62_v21 = vpop.permute.xlu0 %61 }
  0x84   :  { %v52_v23 = vpop.permute.xlu1 %51 }
  0x86   :  { %v57_v27 = vpop.permute.xlu0 %56 }
  0x88   :  { %v47_v32 = vpop.permute.xlu1 %46 }
  0x8a   :  { %v196_v41 = vpop.permute.xlu0 %195 }
  0x8c   :  { %v191_v43 = vpop.permute.xlu1 %190 }
  0x8e   :  { %v186_v47 = vpop.permute.xlu0 %185 }
  0x90   :  { %v181_v52 = vpop.permute.xlu1 %180 }
  0x92   :  { %v326_v61 = vpop.permute.xlu0 %325 }
  0x94   :  { %v321_v63 = vpop.permute.xlu1 %320 }
  0x96   :  { %v316_v3 = vpop.permute.xlu0 %315 }
  0x98   :  { %v311_v8 = vpop.permute.xlu1 %310 }
  0x9a   :  { %v434_v17 = vpop.permute.xlu0 %433 }
  0x9b   :  { %v439_v18 = vrot.slane %v434_v17, %v438_v16 }
  0xc6   :  { %v572_v22 = vpop.f32.mrf.mxu0 }
  0xc7   :  { %v153_v29 = vadd.f32 %v572_v22, %v52_v23 }
  0xc8   :  { %v147_v24 = vpop.f32.mrf.mxu0 }
  0xc9   :  { %v148_v33 = vadd.f32 %v147_v24, %v47_v32  ;;  %v167_v35 = vmax.f32 %v153_v29, 0.0 }
  0xca   :  { %v575_v25 = vpop.f32.mrf.mxu0 }
  0xcb   :  { %v163_v26 = vadd.f32 %v575_v25, %v62_v21  ;;  %v166_v36 = vmax.f32 %v148_v33, 0.0 }
  0xcc   :  { %v157_v28 = vpop.f32.mrf.mxu0 }
  0xcd   :  { %v169_v30 = vmax.f32 %v163_v26, 0.0  ;;  %v158_v31 = vadd.f32 %v157_v28, %v57_v27 }
  0xcf   :  { %v168_v34 = vmax.f32 %v158_v31, 0.0  ;;  %576 = vmatprep.subr.mxu1 %v169_v30 }
  0xd0   :  { %577 = vmatpush3.msra.mxu1 %v169_v30 }
  0xd1   :  { %578 = vmatprep.subr.mxu1 %v168_v34 }
  0xd2   :  { %579 = vmatpush3.msra.mxu1 %v168_v34 }
  0xd3   :  { %580 = vmatprep.subr.mxu1 %v167_v35 }
  0xd4   :  { %581 = vmatpush3.msra.mxu1 %v167_v35 }
  0xd5   :  { %582 = vmatprep.subr.mxu1 %v166_v36 }
  0xd6   :  { %583 = vmatpush3.msra.mxu1 %v166_v36 }
  0xd7   :  { %585 = vmatmul.mubr.msk.f32.vlgmr.msra.gmra.mxu1 %vm198_vm2, %v171_v37  ;;  %604 = vmatprep.subr.mxu1 %v644_v60 }
  0xd8   :  { %587 = vmatprep.mubr.msk.f32.mxu1 %vm198_vm2, %v172_v38 }
  0xdb   :  { %588 = vmatmul.mubr.msk.f32.gmra.mxu1 %vm198_vm2, %v173_v39 }
  0xdc   :  { %612 = vmatprep.mubr.msk.f32.mxu1 %vm645_vm3, %v644_v60 }
 0x197   :  { %v586_v42 = vpop.f32.mrf.mxu1 }
 0x198   :  { %v283_v49 = vadd.f32 %v586_v42, %v186_v47 }
 0x199   :  { %v277_v44 = vpop.f32.mrf.mxu1 }
 0x19a   :  { %v278_v53 = vadd.f32 %v277_v44, %v181_v52  ;;  %v297_v55 = vmax.f32 %v283_v49, 0.0 }
 0x19b   :  { %v589_v45 = vpop.f32.mrf.mxu1 }
 0x19c   :  { %v293_v46 = vadd.f32 %v589_v45, %v196_v41  ;;  %v296_v56 = vmax.f32 %v278_v53, 0.0 }
 0x19d   :  { %v287_v48 = vpop.f32.mrf.mxu1 }
 0x19e   :  { %v299_v50 = vmax.f32 %v293_v46, 0.0  ;;  %v288_v51 = vadd.f32 %v287_v48, %v191_v43 }
 0x1a0   :  { %v298_v54 = vmax.f32 %v288_v51, 0.0  ;;  %590 = vmatprep.subr.mxu0 %v299_v50 }
 0x1a1   :  { %591 = vmatpush3.msra.mxu0 %v299_v50 }
 0x1a2   :  { %592 = vmatprep.subr.mxu0 %v298_v54 }
 0x1a3   :  { %593 = vmatpush3.msra.mxu0 %v298_v54 }
 0x1a4   :  { %594 = vmatprep.subr.mxu0 %v297_v55 }
 0x1a5   :  { %595 = vmatpush3.msra.mxu0 %v297_v55 }
 0x1a6   :  { %596 = vmatprep.subr.mxu0 %v296_v56 }
 0x1a7   :  { %597 = vmatpush3.msra.mxu0 %v296_v56 }
 0x1a8   :  { %599 = vmatmul.mubr.msk.f32.vlgmr.msra.gmra.mxu0 %vm198_vm2, %v301_v57 }
 0x1a9   :  { %601 = vmatprep.mubr.msk.f32.mxu0 %vm198_vm2, %v302_v58 }
 0x1ac   :  { %602 = vmatmul.mubr.msk.f32.gmra.mxu0 %vm198_vm2, %v303_v59 }
 0x268   :  { %v600_v62 = vpop.f32.mrf.mxu0 }
 0x269   :  { %v412_v5 = vadd.f32 %v600_v62, %v316_v3 }
 0x26a   :  { %v406_v0 = vpop.f32.mrf.mxu0 }
 0x26b   :  { %v407_v9 = vadd.f32 %v406_v0, %v311_v8  ;;  %v426_v11 = vmax.f32 %v412_v5, 0.0 }
 0x26c   :  { %v603_v1 = vpop.f32.mrf.mxu0 }
 0x26d   :  { %v422_v2 = vadd.f32 %v603_v1, %v326_v61  ;;  %v425_v12 = vmax.f32 %v407_v9, 0.0 }
 0x26e   :  { %v416_v4 = vpop.f32.mrf.mxu0 }
 0x26f   :  { %v428_v6 = vmax.f32 %v422_v2, 0.0  ;;  %v417_v7 = vadd.f32 %v416_v4, %v321_v63 }
 0x271   :  { %v427_v10 = vmax.f32 %v417_v7, 0.0  ;;  %605 = vmatpush3.msra.mxu1 %v428_v6 }
 0x272   :  { %606 = vmatprep.subr.mxu1 %v644_v60 }
 0x273   :  { %607 = vmatpush3.msra.mxu1 %v427_v10 }
 0x274   :  { %608 = vmatprep.subr.mxu1 %v644_v60 }
 0x275   :  { %609 = vmatpush3.msra.mxu1 %v426_v11 }
 0x276   :  { %610 = vmatprep.subr.mxu1 %v644_v60 }
 0x277   :  { %611 = vmatpush3.msra.mxu1 %v425_v12 }
 0x278   :  { %613 = vmatmul.mubr.msk.f32.vlgmr.msra.gmra.mxu1 %vm198_vm2, %v429_v13 }
 0x338   :  { %v509_v19 = vpop.f32.mrf.mxu1 }
 0x339   :  { %v510_v20 = vadd.f32 %v509_v19, %v439_v18 }
 0x33a   :  { %v614_v21 = vpop.f32.mrf.mxu1 }
 0x33b   :  { %513 = vst [vmem:[#allocation3] sm:$0x1] %v510_v20 }
 0x33c   :  { %632 = shalt.err (!%p629_p4)
}
 0x33d   :  { %523 = dma.vmem_to_hbm [thread:$0]  %s521_s2, 16, %s803_s9, [#allocation4]  }
 0x33e   :  { %641 = dma.done.wait [#allocation4], 16  }
 0x33f   :  { %642 = vsyncadd [#allocation4], 4294967280 }
 0x340   :  { %527 = vsyncpa [#allocation4], 1 }

</bundles_post_ra>
